<compile_context>
chip_gen: v7x
topology: tpu7x:2x2x1
jax: 0.10.0
libtpu: 0.0.40
codegen_flags: <defaults>
</compile_context>

<pallas_src>
import jax
import jax.numpy as jnp
from jax.experimental import pallas as pl
from jax.experimental.pallas import tpu as pltpu

HID = 128            # prediction-embedding width (synthetic model hidden size)
N_ACT = 256          # action logits (matches predict_actions.reshape(-1, 256))
N_OUT = N_ACT + HID  # fused two-head output width (384 = 3*128, lane-dense)
MAX_TB = 512         # batch-tile cap: MXU-sized, >=2 grid steps for large B


def agent_kernel(x_ref, w1_ref, w2_ref, b_ref, out_ref):
    # x:  (TB, K_pad)       bf16  fused [obs_flat | txt_pool | states] (+pad)
    # w1: (K_pad, HID)      bf16  fused [w_obs ; w_txt ; w_st] (+pad)
    # w2: (HID, N_OUT)      bf16  fused [w_act | w_pred]
    # b:  (1, HID + N_OUT)  f32   fused [b_h | b_act | b_pred]
    h = jnp.dot(x_ref[...], w1_ref[...], preferred_element_type=jnp.float32)
    h = jnp.maximum(h + b_ref[:, :HID], 0.0)                    # (TB, HID) f32
    out = jnp.dot(h.astype(jnp.bfloat16), w2_ref[...],
                  preferred_element_type=jnp.float32)            # (TB, N_OUT) f32
    out_ref[...] = (out + b_ref[:, HID:]).astype(out_ref.dtype)


def prepare_params(params):
    """One-time weight fusion / K-pad / bf16 cast (hoisted out of forward)."""
    (w_obs, w_txt, w_st, b_h, w_act, b_act, w_pred, b_pred) = params
    # Texts are mean-pooled in the wrapper, so w_txt goes in untiled (no /T fold).
    w1 = jnp.concatenate([w_obs, w_txt, w_st], axis=0)           # (K, HID)
    K = w1.shape[0]
    K_pad = ((K + 127) // 128) * 128
    if K_pad != K:
        w1 = jnp.pad(w1, ((0, K_pad - K), (0, 0)))
    w2 = jnp.concatenate([w_act, w_pred], axis=1)                # (HID, N_OUT)
    b = jnp.concatenate([b_h, b_act, b_pred], axis=1)            # (1, HID+N_OUT)
    return {
        "w1": w1.astype(jnp.bfloat16),
        "w2": w2.astype(jnp.bfloat16),
        "b": b.astype(jnp.float32),
        "K": int(K),
        "K_pad": int(K_pad),
    }


def agent_forward(obs, texts, states, fused):
    """obs: (B,C,H,W) f32, texts: (B,T,D_txt) f32, states: (B,S) f32."""
    B = obs.shape[0]
    K, K_pad = fused["K"], fused["K_pad"]

    # --- activation assembly (bf16 before concat/pad: half the copy bytes) ---
    obs_flat = obs.reshape(B, -1).astype(jnp.bfloat16)           # (B, C*H*W)
    txt_pool = jnp.mean(texts, axis=1).astype(jnp.bfloat16)      # (B, D_txt) token mean-pool
    states_bf = states.astype(jnp.bfloat16)                      # (B, S)
    x = jnp.concatenate([obs_flat, txt_pool, states_bf], axis=1)  # (B, K) bf16
    if K_pad != K:
        x = jnp.pad(x, ((0, 0), (0, K_pad - K)))

    # --- generation-aware batch tiling ---
    # small/moderate B -> single grid step (no per-step pipeline overhead);
    # large B -> 512-row tiles (>=2 steps so both v7x TensorCores get work).
    B16 = ((B + 15) // 16) * 16                                  # bf16 sublane packing
    TB = B16 if B16 <= MAX_TB else MAX_TB
    B_pad = ((B + TB - 1) // TB) * TB
    if B_pad != B:
        # NOTE: padded rows flow as zeros -> relu(b_h) garbage; sliced off below.
        x = jnp.pad(x, ((0, B_pad - B), (0, 0)))

    grid = (B_pad // TB,)

    # cost estimate recomputed from the actual tiling
    flops = 2 * B_pad * (K_pad * HID + HID * N_OUT)
    bytes_accessed = (B_pad * K_pad * 2 + K_pad * HID * 2 + HID * N_OUT * 2
                      + (HID + N_OUT) * 4 + B_pad * N_OUT * 4)

    # raise scoped VMEM only if the double-buffered working set needs it (v5e: 16 MiB default)
    vmem_needed = (2 * TB * (K_pad * 2 + N_OUT * 4)          # x bf16 + out f32, double-buffered
                   + K_pad * HID * 2 + HID * N_OUT * 2       # resident weights (bf16)
                   + (HID + N_OUT) * 4)                      # resident bias (f32)
    cp_kwargs = {"dimension_semantics": ("parallel",)}
    if vmem_needed > 16 * 1024 * 1024:
        cp_kwargs["vmem_limit_bytes"] = min(int(1.5 * vmem_needed), 56 * 1024 * 1024)

    out = pl.pallas_call(
        agent_kernel,
        out_shape=jax.ShapeDtypeStruct((B_pad, N_OUT), jnp.float32),
        grid_spec=pltpu.PrefetchScalarGridSpec(
            num_scalar_prefetch=0,
            grid=grid,
            in_specs=[
                pl.BlockSpec((TB, K_pad), lambda i: (i, 0)),       # activations: per batch tile
                pl.BlockSpec((K_pad, HID), lambda i: (0, 0)),      # fused W1: VMEM-resident
                pl.BlockSpec((HID, N_OUT), lambda i: (0, 0)),      # fused W2: VMEM-resident
                pl.BlockSpec((1, HID + N_OUT), lambda i: (0, 0)),  # fused bias: VMEM-resident
            ],
            out_specs=pl.BlockSpec((TB, N_OUT), lambda i: (i, 0)),
        ),
        compiler_params=pltpu.CompilerParams(**cp_kwargs),
        cost_estimate=pl.CostEstimate(flops=flops, transcendentals=0,
                                      bytes_accessed=bytes_accessed),
    )(x, fused["w1"], fused["w2"], fused["b"])

    actions = out[:B, :N_ACT]       # (B, 256) action logits
    prediction = out[:B, N_ACT:]    # (B, HID) prediction embedding
    return actions, prediction


def init_params(key, f_obs, d_txt, s_dim, hid=HID, n_act=N_ACT):
    ks = jax.random.split(key, 8)
    scale = 0.02
    w_obs = scale * jax.random.normal(ks[0], (f_obs, hid), jnp.float32)
    w_txt = scale * jax.random.normal(ks[1], (d_txt, hid), jnp.float32)
    w_st = scale * jax.random.normal(ks[2], (s_dim, hid), jnp.float32)
    b_h = scale * jax.random.normal(ks[3], (1, hid), jnp.float32)
    w_act = scale * jax.random.normal(ks[4], (hid, n_act), jnp.float32)
    b_act = scale * jax.random.normal(ks[5], (1, n_act), jnp.float32)
    w_pred = scale * jax.random.normal(ks[6], (hid, hid), jnp.float32)
    b_pred = scale * jax.random.normal(ks[7], (1, hid), jnp.float32)
    return (w_obs, w_txt, w_st, b_h, w_act, b_act, w_pred, b_pred)


def reference_forward(obs, texts, states, params):
    """Pure-JAX reference with matching bf16 operand rounding (f32 accumulation)."""
    (w_obs, w_txt, w_st, b_h, w_act, b_act, w_pred, b_pred) = params
    B = obs.shape[0]
    bf = lambda a: a.astype(jnp.bfloat16).astype(jnp.float32)
    obs_flat = bf(obs.reshape(B, -1))
    txt_pool = bf(jnp.mean(texts, axis=1))
    st = bf(states)
    h = jnp.maximum(obs_flat @ bf(w_obs) + txt_pool @ bf(w_txt) + st @ bf(w_st) + b_h, 0.0)
    h = bf(h)
    return h @ bf(w_act) + b_act, h @ bf(w_pred) + b_pred


if __name__ == "__main__":
    key = jax.random.PRNGKey(0)
    k_obs, k_txt, k_st, k_par = jax.random.split(key, 4)

    B, C, H, W = 2, 4, 16, 16       # obs image, NCHW
    T, D_txt = 8, 32                # text token embeddings
    S = 8                           # proprio state dim

    obs = jax.random.normal(k_obs, (B, C, H, W), jnp.float32)
    texts = jax.random.normal(k_txt, (B, T, D_txt), jnp.float32)
    states = jax.random.normal(k_st, (B, S), jnp.float32)
    params = init_params(k_par, C * H * W, D_txt, S)

    # one-time parameter fusion (would be cached on the Agent in real use)
    fused = prepare_params(params)
    jax.block_until_ready((fused["w1"], fused["w2"], fused["b"]))

    actions, prediction = agent_forward(obs, texts, states, fused)
    jax.block_until_ready((actions, prediction))

    # correctness check against bf16-matched pure-JAX reference
    ref_actions, ref_prediction = reference_forward(obs, texts, states, params)
    assert actions.shape == (B, N_ACT) and prediction.shape == (B, HID)
    assert jnp.allclose(actions, ref_actions, atol=1e-2, rtol=1e-2)
    assert jnp.allclose(prediction, ref_prediction, atol=1e-2, rtol=1e-2)

    print("KERNEL_OK")
</pallas_src>

<mosaic_0001>
module attributes {stable_mosaic.version = 11 : i64} {
  func.func @agent_kernel(%arg0: i32, %arg1: memref<16x1152xbf16, #tpu.memory_space<vmem>>, %arg2: memref<1152x128xbf16, #tpu.memory_space<vmem>>, %arg3: memref<128x384xbf16, #tpu.memory_space<vmem>>, %arg4: memref<1x512xf32, #tpu.memory_space<vmem>>, %arg5: memref<16x384xf32, #tpu.memory_space<vmem>>) attributes {dimension_semantics = [#tpu.dimension_semantics<parallel>], iteration_bounds = array<i64: 1>, scalar_prefetch = 0 : i64, scratch_operands = 0 : i64, tpu.core_type = #tpu.core_type<tc>, window_params = [{transform_indices = @transform_0, window_bounds = array<i64: 16, 1152>}, {pipeline_mode = #tpu.pipeline_mode<synchronous>, transform_indices = @transform_1, window_bounds = array<i64: 1152, 128>}, {pipeline_mode = #tpu.pipeline_mode<synchronous>, transform_indices = @transform_2, window_bounds = array<i64: 128, 384>}, {pipeline_mode = #tpu.pipeline_mode<synchronous>, transform_indices = @transform_3, window_bounds = array<i64: 1, 512>}, {transform_indices = @transform_4, window_bounds = array<i64: 16, 384>}]} {
    %c0 = arith.constant 0 : index
    %c0_0 = arith.constant 0 : index
    %0 = vector.load %arg1[%c0, %c0_0] : memref<16x1152xbf16, #tpu.memory_space<vmem>>, vector<16x1152xbf16>
    %c0_1 = arith.constant 0 : index
    %c0_2 = arith.constant 0 : index
    %1 = vector.load %arg2[%c0_1, %c0_2] : memref<1152x128xbf16, #tpu.memory_space<vmem>>, vector<1152x128xbf16>
    %cst = arith.constant dense<0.000000e+00> : vector<16x128xf32>
    %2 = tpu.matmul %0, %1, %cst {dimension_numbers = #tpu.dot_dimension_numbers<[1], [0], [0], [1], [0, 0, 1, 1], [], []>} : vector<16x1152xbf16>, vector<1152x128xbf16>, vector<16x128xf32> -> vector<16x128xf32>
    %c0_3 = arith.constant 0 : index
    %c0_4 = arith.constant 0 : index
    %3 = vector.load %arg4[%c0_3, %c0_4] : memref<1x512xf32, #tpu.memory_space<vmem>>, vector<1x128xf32>
    %4 = vector.broadcast %3 : vector<1x128xf32> to vector<16x128xf32>
    %5 = arith.addf %2, %4 : vector<16x128xf32>
    %cst_5 = arith.constant 0.000000e+00 : f32
    %6 = vector.broadcast %cst_5 : f32 to vector<16x128xf32>
    %7 = arith.maximumf %5, %6 : vector<16x128xf32>
    %8 = arith.truncf %7 : vector<16x128xf32> to vector<16x128xbf16>
    %c0_6 = arith.constant 0 : index
    %c0_7 = arith.constant 0 : index
    %9 = vector.load %arg3[%c0_6, %c0_7] : memref<128x384xbf16, #tpu.memory_space<vmem>>, vector<128x384xbf16>
    %cst_8 = arith.constant dense<0.000000e+00> : vector<16x384xf32>
    %10 = tpu.matmul %8, %9, %cst_8 {dimension_numbers = #tpu.dot_dimension_numbers<[1], [0], [0], [1], [0, 0, 1, 1], [], []>} : vector<16x128xbf16>, vector<128x384xbf16>, vector<16x384xf32> -> vector<16x384xf32>
    %c0_9 = arith.constant 0 : index
    %c128 = arith.constant 128 : index
    %11 = vector.load %arg4[%c0_9, %c128] : memref<1x512xf32, #tpu.memory_space<vmem>>, vector<1x384xf32>
    %12 = vector.broadcast %11 : vector<1x384xf32> to vector<16x384xf32>
    %13 = arith.addf %10, %12 : vector<16x384xf32>
    %c0_10 = arith.constant 0 : index
    %c0_11 = arith.constant 0 : index
    %14 = vector.load %arg5[%c0_10, %c0_11] : memref<16x384xf32, #tpu.memory_space<vmem>>, vector<16x384xf32>
    tpu.vector_store %arg5[%c0_10, %c0_11], %13 {strides = array<i32>} : memref<16x384xf32, #tpu.memory_space<vmem>>, vector<16x384xf32>,
    return
  }
  func.func @transform_0(%arg0: i32) -> (i32, i32) {
    %c0_i32 = arith.constant 0 : i32
    %c0_i32_0 = arith.constant 0 : i32
    return %arg0, %c0_i32 : i32, i32
  }
  func.func @transform_1(%arg0: i32) -> (i32, i32) {
    %c0_i32 = arith.constant 0 : i32
    %c0_i32_0 = arith.constant 0 : i32
    %c0_i32_1 = arith.constant 0 : i32
    return %c0_i32, %c0_i32_0 : i32, i32
  }
  func.func @transform_2(%arg0: i32) -> (i32, i32) {
    %c0_i32 = arith.constant 0 : i32
    %c0_i32_0 = arith.constant 0 : i32
    %c0_i32_1 = arith.constant 0 : i32
    return %c0_i32, %c0_i32_0 : i32, i32
  }
  func.func @transform_3(%arg0: i32) -> (i32, i32) {
    %c0_i32 = arith.constant 0 : i32
    %c0_i32_0 = arith.constant 0 : i32
    %c0_i32_1 = arith.constant 0 : i32
    return %c0_i32, %c0_i32_0 : i32, i32
  }
  func.func @transform_4(%arg0: i32) -> (i32, i32) {
    %c0_i32 = arith.constant 0 : i32
    %c0_i32_0 = arith.constant 0 : i32
    return %arg0, %c0_i32 : i32, i32
  }
}

</mosaic_0001>

<bundles_post_ra>
// kernel: tpu_custom_call.1
= control target key start
LH: loop header
LB: loop body
LE: loop exit
PB: predicated region body
PF: predicated region fallthrough
CT: control target
= control target key end

     0   :  { %9 = vsyncpa [#allocation3], 0  ;;  %s1784_s0 = inlined_call_operand.hbm [shape: bf16[16,1152], index: 0, kind: input, shape index: {}]   ;;  %s1785_s1 = inlined_call_operand.hbm [shape: bf16[1152,128], index: 1, kind: input, shape index: {}]   ;;  %s1786_s2 = inlined_call_operand.hbm [shape: bf16[128,384], index: 2, kind: input, shape index: {}]   ;;  %s1787_s3 = inlined_call_operand.vmem [shape: f32[1,512], index: 3, kind: input, shape index: {}]   ;;  %s1788_s4 = inlined_call_operand.hbm [shape: f32[16,384], index: 4, kind: output, shape index: {}]  }
   0x1   :  { %10 = vsyncpa [#allocation6], 0 }
   0x2   :  { %11 = vsyncpa [#allocation4], 0  ;;  %s1670_s15 = smov [#allocation5]   ;;  %s1576_s19 = scalar_lea.hbm %s1785_s1, 9216 }
   0x3   :  { %s29_s16 = sshll.u32 %s1670_s15, 4  ;;  %p1577_p0 = scmp.ne.s32.totalorder %s1785_s1, %s1576_s19  ;;  %s30_s16 = int_to_ptr.vmem [resolvable:$true] %s29_s16 }
   0x4   :  { %p1580_p1 = scmp.lt.u32.totalorder %s1576_s19, %s1785_s1 }
   0x6   :  { %p1582_p2 = pnand %p1580_p1, %p1577_p0 }
   0x8   :  { %1585 = shalt.err (!%p1582_p2)
}
   0x9   :  { %s1586_s24 = scalar_lea.vmem %s30_s16, 9216  ;;  %p1591_p4 = scmp.lt.s32.totalorder %s30_s16, %s30_s16 }
   0xa   :  { %p1587_p3 = scmp.ne.s32.totalorder %s30_s16, %s1586_s24  ;;  %p1592_p5 = scmp.lt.s32.totalorder %s1586_s24, %s1586_s24 }
   0xc   :  { %p1593_p6 = por %p1592_p5, %p1591_p4 }
   0xe   :  { %p1594_p7 = pnand %p1593_p6, %p1587_p3 }
  0x10   :  { %1597 = shalt.err (!%p1594_p7)
}
  0x11   :  { %s1671_s25 = smov 64   ;;  %s1672_s26 = smov 4  }
  0x12   :  { %35 = dma.hbm_to_vmem [thread:$0]  %s1785_s1, 9216, %s30_s16, [#allocation6], %s1671_s25, %s1671_s25, %s1672_s26  }
  0x13   :  { %s1673_s29 = smov [#allocation2]   ;;  %s1598_s7 = scalar_lea.hbm %s1784_s0, 1152 }
  0x14   :  { %s17_s30 = sshll.u32 %s1673_s29, 4  ;;  %p1599_p8 = scmp.ne.s32.totalorder %s1784_s0, %s1598_s7  ;;  %s18_s30 = int_to_ptr.vmem [resolvable:$true] %s17_s30 }
  0x15   :  { %p1602_p9 = scmp.lt.u32.totalorder %s1598_s7, %s1784_s0 }
  0x17   :  { %p1604_p10 = pnand %p1602_p9, %p1599_p8 }
  0x19   :  { %1607 = shalt.err (!%p1604_p10)
}
  0x1a   :  { %s1608_s12 = scalar_lea.vmem %s18_s30, 1152  ;;  %p1613_p12 = scmp.lt.s32.totalorder %s18_s30, %s18_s30 }
  0x1b   :  { %p1609_p11 = scmp.ne.s32.totalorder %s18_s30, %s1608_s12  ;;  %p1614_p13 = scmp.lt.s32.totalorder %s1608_s12, %s1608_s12 }
  0x1d   :  { %p1615_p0 = por %p1614_p13, %p1613_p12 }
  0x1f   :  { %p1616_p1 = pnand %p1615_p0, %p1609_p11 }
  0x21   :  { %1619 = shalt.err (!%p1616_p1)
}
  0x22   :  { %s1674_s1 = smov 576   ;;  %s1675_s13 = smov 36  }
  0x23   :  { %23 = dma.hbm_to_vmem [thread:$0]  %s1784_s0, 1152, %s18_s30, [#allocation3], %s1674_s1, %s1674_s1, %s1675_s13  }
  0x24   :  { %s1676_s16 = smov [#allocation7]   ;;  %s1620_s20 = scalar_lea.hbm %s1786_s2, 3072 }
  0x25   :  { %s41_s17 = sshll.u32 %s1676_s16, 4  ;;  %p1621_p2 = scmp.ne.s32.totalorder %s1786_s2, %s1620_s20  ;;  %s42_s17 = int_to_ptr.vmem [resolvable:$true] %s41_s17 }
  0x26   :  { %p1624_p3 = scmp.lt.u32.totalorder %s1620_s20, %s1786_s2 }
  0x28   :  { %p1626_p4 = pnand %p1624_p3, %p1621_p2 }
  0x2a   :  { %1629 = shalt.err (!%p1626_p4)
}
  0x2b   :  { %s1630_s25 = scalar_lea.vmem %s42_s17, 3072  ;;  %p1635_p6 = scmp.lt.s32.totalorder %s42_s17, %s42_s17 }
  0x2c   :  { %p1631_p5 = scmp.ne.s32.totalorder %s42_s17, %s1630_s25  ;;  %p1636_p7 = scmp.lt.s32.totalorder %s1630_s25, %s1630_s25 }
  0x2e   :  { %p1637_p8 = por %p1636_p7, %p1635_p6 }
  0x30   :  { %p1638_p9 = pnand %p1637_p8, %p1631_p5 }
  0x32   :  { %1641 = shalt.err (!%p1638_p9)
}
  0x33   :  { %s1677_s0 = smov 192   ;;  %s1678_s26 = smov 12  }
  0x34   :  { %47 = dma.hbm_to_vmem [thread:$0]  %s1786_s2, 3072, %s42_s17, [#allocation6], %s1677_s0, %s1677_s0, %s1678_s26  }
  0x35   :  { %1664 = dma.done.wait [#allocation3], 1152  }
  0x36   :  { %1665 = vsyncadd [#allocation3], 4294966144 }
  0x37   :  { %1666 = dma.done.wait [#allocation6], 12288  }
  0x38   :  { %1667 = vsyncadd [#allocation6], 4294955008  ;;  %v1459_v0 = vld [vmem:[#allocation5 + $0x40] sm:$0xff]   ;;  %v1463_v4 = vld [vmem:[#allocation5 + $0x48] sm:$0xff]   ;;  %vm1680_vm0 = vmmov 0   ;;  %s1682_s6 = smov [#allocation8]  }
  0x39   :  { %v1460_v1 = vld [vmem:[#allocation5] sm:$0xff]   ;;  %1298 = vmatprep.subr.bf16.mxu0 %v1459_v0  ;;  %v1464_v5 = vld [vmem:[#allocation5 + $0x8] sm:$0xff]   ;;  %v1467_v8 = vld [vmem:[#allocation5 + $0x50] sm:$0xff]   ;;  %s1179_s7 = sshll.u32 %s1682_s6, 4  ;;  %s1180_s7 = int_to_ptr.vmem [resolvable:$true] %s1179_s7 }
  0x3a   :  { %v1461_v2 = vld [vmem:[#allocation5 + $0xc0] sm:$0xff]   ;;  %1299 = vmatpush3.bf16.msra.mxu0 %v1460_v1  ;;  %v1465_v6 = vld [vmem:[#allocation5 + $0xc8] sm:$0xff]   ;;  %v1468_v9 = vld [vmem:[#allocation5 + $0x10] sm:$0xff]   ;;  %p1647_p11 = scmp.lt.s32.totalorder %s1180_s7, %s1180_s7 }
  0x3b   :  { %v1462_v3 = vld [vmem:[#allocation5 + $0x80] sm:$0xff]   ;;  %1320 = vmatprep.subr.bf16.mxu1 %v1461_v2  ;;  %1300 = vmatprep.subr.bf16.mxu0 %v1463_v4  ;;  %v1466_v7 = vld [vmem:[#allocation5 + $0x88] sm:$0xff]   ;;  %v1469_v10 = vld [vmem:[#allocation5 + $0xd0] sm:$0xff]  }
  0x3c   :  { %1321 = vmatpush3.bf16.msra.mxu1 %v1462_v3  ;;  %v1470_v11 = vld [vmem:[#allocation5 + $0x90] sm:$0xff]   ;;  %v1471_v12 = vld [vmem:[#allocation5 + $0x58] sm:$0xff]   ;;  %v1475_v16 = vld [vmem:[#allocation5 + $0x60] sm:$0xff]  }
  0x3d   :  { %1322 = vmatprep.subr.bf16.mxu1 %v1465_v6  ;;  %v1472_v13 = vld [vmem:[#allocation5 + $0x18] sm:$0xff]   ;;  %v1476_v17 = vld [vmem:[#allocation5 + $0x20] sm:$0xff]   ;;  %v1479_v20 = vld [vmem:[#allocation5 + $0x68] sm:$0xff]   ;;  %v1679_v6 = vmov 0.0  }
  0x3e   :  { %1301 = vmatpush3.bf16.msra.mxu0 %v1464_v5  ;;  %v1473_v14 = vld [vmem:[#allocation5 + $0xd8] sm:$0xff]   ;;  %v1477_v18 = vld [vmem:[#allocation5 + $0xe0] sm:$0xff]   ;;  %v1480_v21 = vld [vmem:[#allocation5 + $0x28] sm:$0xff]  }
  0x3f   :  { %1302 = vmatprep.subr.bf16.mxu0 %v1467_v8  ;;  %v1474_v15 = vld [vmem:[#allocation5 + $0x98] sm:$0xff]   ;;  %v1478_v19 = vld [vmem:[#allocation5 + $0xa0] sm:$0xff]   ;;  %v1481_v22 = vld [vmem:[#allocation5 + $0xe8] sm:$0xff]  }
  0x40   :  { %1323 = vmatpush3.bf16.msra.mxu1 %v1466_v7  ;;  %v1482_v23 = vld [vmem:[#allocation5 + $0xa8] sm:$0xff]   ;;  %v1483_v24 = vld [vmem:[#allocation5 + $0x70] sm:$0xff]   ;;  %v1487_v28 = vld [vmem:[#allocation5 + $0x78] sm:$0xff]  }
  0x41   :  { %1324 = vmatprep.subr.bf16.mxu1 %v1469_v10  ;;  %v1484_v25 = vld [vmem:[#allocation5 + $0x30] sm:$0xff]   ;;  %v1488_v29 = vld [vmem:[#allocation5 + $0x38] sm:$0xff]   ;;  %v1494_v34 = vld [vmem:[#allocation5 + $0x140] sm:$0xff]  }
  0x42   :  { %1303 = vmatpush3.bf16.msra.mxu0 %v1468_v9  ;;  %v1485_v26 = vld [vmem:[#allocation5 + $0xf0] sm:$0xff]   ;;  %v1489_v30 = vld [vmem:[#allocation5 + $0xf8] sm:$0xff]   ;;  %v1495_v35 = vld [vmem:[#allocation2 + $0x8] ss:$36 sps:$4 sm:$0xff]  }
  0x43   :  { %1304 = vmatprep.subr.bf16.mxu0 %v1471_v12  ;;  %v1486_v27 = vld [vmem:[#allocation5 + $0xb0] sm:$0xff]   ;;  %v1490_v31 = vld [vmem:[#allocation2] ss:$36 sps:$4 sm:$0xff]   ;;  %v1497_v36 = vld [vmem:[#allocation2 + $0xc] ss:$36 sps:$4 sm:$0xff]  }
  0x44   :  { %1325 = vmatpush3.bf16.msra.mxu1 %v1470_v11  ;;  %v1492_v32 = vld [vmem:[#allocation2 + $0x4] ss:$36 sps:$4 sm:$0xff]   ;;  %772 = vmatprep.mubr.bf16.mxu1 %v1497_v36  ;;  %v1501_v40 = vld [vmem:[#allocation5 + $0x148] sm:$0xff]   ;;  %v1505_v44 = vld [vmem:[#allocation5 + $0x150] sm:$0xff]  }
  0x45   :  { %1326 = vmatprep.subr.bf16.mxu1 %v1473_v14  ;;  %v1493_v33 = vld [vmem:[#allocation5 + $0xb8] sm:$0xff]   ;;  %731 = vmatprep.mubr.bf16.mxu0 %v1492_v32  ;;  %v1498_v37 = vld [vmem:[#allocation5 + $0x100] sm:$0xff]   ;;  %v1502_v41 = vld [vmem:[#allocation5 + $0x108] sm:$0xff]  }
  0x46   :  { %1305 = vmatpush3.bf16.msra.mxu0 %v1472_v13  ;;  %v1499_v38 = vld [vmem:[#allocation5 + $0x1c0] sm:$0xff]   ;;  %v1503_v42 = vld [vmem:[#allocation5 + $0x1c8] sm:$0xff]   ;;  %v1506_v45 = vld [vmem:[#allocation5 + $0x110] sm:$0xff]  }
  0x47   :  { %1306 = vmatprep.subr.bf16.mxu0 %v1475_v16  ;;  %v1500_v39 = vld [vmem:[#allocation5 + $0x180] sm:$0xff]   ;;  %v1504_v43 = vld [vmem:[#allocation5 + $0x188] sm:$0xff]   ;;  %v1507_v46 = vld [vmem:[#allocation5 + $0x1d0] sm:$0xff]  }
  0x48   :  { %1327 = vmatpush3.bf16.msra.mxu1 %v1474_v15  ;;  %v1508_v47 = vld [vmem:[#allocation5 + $0x190] sm:$0xff]   ;;  %v1509_v48 = vld [vmem:[#allocation5 + $0x158] sm:$0xff]   ;;  %v1513_v52 = vld [vmem:[#allocation5 + $0x160] sm:$0xff]  }
  0x49   :  { %1328 = vmatprep.subr.bf16.mxu1 %v1477_v18  ;;  %v1510_v49 = vld [vmem:[#allocation5 + $0x118] sm:$0xff]   ;;  %v1514_v53 = vld [vmem:[#allocation5 + $0x120] sm:$0xff]   ;;  %v1517_v56 = vld [vmem:[#allocation5 + $0x168] sm:$0xff]  }
  0x4a   :  { %1307 = vmatpush3.bf16.msra.mxu0 %v1476_v17  ;;  %v1511_v50 = vld [vmem:[#allocation5 + $0x1d8] sm:$0xff]   ;;  %v1515_v54 = vld [vmem:[#allocation5 + $0x1e0] sm:$0xff]   ;;  %v1518_v57 = vld [vmem:[#allocation5 + $0x128] sm:$0xff]  }
  0x4b   :  { %1308 = vmatprep.subr.bf16.mxu0 %v1479_v20  ;;  %v1512_v51 = vld [vmem:[#allocation5 + $0x198] sm:$0xff]   ;;  %v1516_v55 = vld [vmem:[#allocation5 + $0x1a0] sm:$0xff]   ;;  %v1519_v58 = vld [vmem:[#allocation5 + $0x1e8] sm:$0xff]  }
  0x4c   :  { %1329 = vmatpush3.bf16.msra.mxu1 %v1478_v19  ;;  %v1520_v59 = vld [vmem:[#allocation5 + $0x1a8] sm:$0xff]   ;;  %v1521_v60 = vld [vmem:[#allocation5 + $0x170] sm:$0xff]   ;;  %v1525_v0 = vld [vmem:[#allocation5 + $0x178] sm:$0xff]  }
  0x4d   :  { %1330 = vmatprep.subr.bf16.mxu1 %v1481_v22  ;;  %v1522_v61 = vld [vmem:[#allocation5 + $0x130] sm:$0xff]   ;;  %v1526_v1 = vld [vmem:[#allocation5 + $0x138] sm:$0xff]   ;;  %v1528_v3 = vld [vmem:[#allocation2 + $0x10] ss:$36 sps:$4 sm:$0xff]  }
  0x4e   :  { %1309 = vmatpush3.bf16.msra.mxu0 %v1480_v21  ;;  %v1523_v62 = vld [vmem:[#allocation5 + $0x1f0] sm:$0xff]   ;;  %v1527_v2 = vld [vmem:[#allocation5 + $0x1f8] sm:$0xff]   ;;  %v1535_v9 = vld [vmem:[#allocation5 + $0x200] sm:$0xff]  }
  0x4f   :  { %1310 = vmatprep.subr.bf16.mxu0 %v1483_v24  ;;  %v1524_v63 = vld [vmem:[#allocation5 + $0x1b0] sm:$0xff]   ;;  %v1531_v5 = vld [vmem:[#allocation5 + $0x1b8] sm:$0xff]   ;;  %v1536_v10 = vld [vmem:[#allocation5 + $0x208] sm:$0xff]  }
  0x50   :  { %1331 = vmatpush3.bf16.msra.mxu1 %v1482_v23  ;;  %v1530_v4 = vld [vmem:[#allocation2 + $0x14] ss:$36 sps:$4 sm:$0xff]   ;;  %v1534_v8 = vld [vmem:[#allocation2 + $0x1c] ss:$36 sps:$4 sm:$0xff]   ;;  %v1539_v13 = vld [vmem:[#allocation5 + $0x220] sm:$0xff]  }
  0x51   :  { %1332 = vmatprep.subr.bf16.mxu1 %v1485_v26  ;;  %v1532_v7 = vld [vmem:[#allocation2 + $0x18] ss:$36 sps:$4 sm:$0xff]   ;;  %v1538_v12 = vld [vmem:[#allocation5 + $0x218] sm:$0xff]   ;;  %v1540_v14 = vld [vmem:[#allocation5 + $0x228] sm:$0xff]  }
  0x52   :  { %1311 = vmatpush3.bf16.msra.mxu0 %v1484_v25  ;;  %v1537_v11 = vld [vmem:[#allocation5 + $0x210] sm:$0xff]   ;;  %v1542_v16 = vld [vmem:[#allocation5 + $0x238] sm:$0xff]   ;;  %v1544_v18 = vld [vmem:[#allocation7] ss:$12 sps:$4 sm:$0xff]  }
  0x53   :  { %1312 = vmatprep.subr.bf16.mxu0 %v1487_v28  ;;  %v1541_v15 = vld [vmem:[#allocation5 + $0x230] sm:$0xff]   ;;  %v1543_v17 = vld [vmem:[#allocation2 + $0x20] ss:$36 sps:$4 sm:$0xff]   ;;  %v1551_v22 = vld [vmem:[#allocation7 + $0x20] ss:$12 sps:$4 sm:$0xff]  }
  0x54   :  { %1333 = vmatpush3.bf16.msra.mxu1 %v1486_v27  ;;  %v1546_v19 = vld [vmem:[#allocation7 + $0x4] ss:$12 sps:$4 sm:$0xff]   ;;  %v1547_v20 = vld [vmem:[#allocation7 + $0x8] ss:$12 sps:$4 sm:$0xff]   ;;  %v1558_v27 = vld [vmem:[#allocation7 + $0x4c] ss:$12 sps:$4 sm:$0xff]  }
  0x55   :  { %1334 = vmatprep.subr.bf16.mxu1 %v1489_v30  ;;  %v1550_v21 = vld [vmem:[#allocation7 + $0x1c] ss:$12 sps:$4 sm:$0xff]   ;;  %v1548_v23 = vld [vmem:[#allocation7 + $0x18] ss:$12 sps:$4 sm:$0xff]   ;;  %v1554_v24 = vld [vmem:[#allocation7 + $0x34] ss:$12 sps:$4 sm:$0xff]  }
  0x56   :  { %1313 = vmatpush3.bf16.msra.mxu0 %v1488_v29  ;;  %v1555_v25 = vld [vmem:[#allocation7 + $0x38] ss:$12 sps:$4 sm:$0xff]   ;;  %v1552_v26 = vld [vmem:[#allocation7 + $0x30] ss:$12 sps:$4 sm:$0xff]   ;;  %v1556_v29 = vld [vmem:[#allocation7 + $0x48] ss:$12 sps:$4 sm:$0xff]  }
  0x57   :  { %1342 = vmatprep.subr.bf16.mxu0 %v1494_v34  ;;  %v1559_v28 = vld [vmem:[#allocation7 + $0x50] ss:$12 sps:$4 sm:$0xff]   ;;  %v1560_v32 = vld [vmem:[#allocation7 + $0x60] ss:$12 sps:$4 sm:$0xff]  }
  0x58   :  { %1335 = vmatpush3.bf16.msra.mxu1 %v1493_v33  ;;  %v1562_v30 = vld [vmem:[#allocation7 + $0x64] ss:$12 sps:$4 sm:$0xff]   ;;  %v1566_v33 = vld [vmem:[#allocation7 + $0x7c] ss:$12 sps:$4 sm:$0xff]   ;;  %v1567_v34 = vld [vmem:[#allocation7 + $0x80] ss:$12 sps:$4 sm:$0xff]  }
  0x59   :  { %732 = vmatmul.mubr.bf16.vlgmr.msra.gmra.mrb[0].mxu0 %v1490_v31  ;;  %1364 = vmatprep.subr.bf16.mxu1 %v1499_v38  ;;  %v1563_v31 = vld [vmem:[#allocation7 + $0x68] ss:$12 sps:$4 sm:$0xff]   ;;  %v1571_v38 = vld [vmem:[#allocation7 + $0x98] ss:$12 sps:$4 sm:$0xff]  }
  0x5a   :  { %1343 = vmatpush3.bf16.msra.mxu0 %v1498_v37  ;;  %813 = vmatprep.mubr.bf16.mxu0 %v1530_v4  ;;  %v1570_v36 = vld [vmem:[#allocation7 + $0x94] ss:$12 sps:$4 sm:$0xff]   ;;  %v1568_v37 = vld [vmem:[#allocation7 + $0x90] ss:$12 sps:$4 sm:$0xff]  }
  0x5b   :  { %773 = vmatmul.mubr.bf16.vlgmr.msra.gmra.mrb[0].mxu1 %v1495_v35  ;;  %1344 = vmatprep.subr.bf16.mxu0 %v1501_v40  ;;  %v1564_v35 = vld [vmem:[#allocation7 + $0x78] ss:$12 sps:$4 sm:$0xff]   ;;  %v1572_v40 = vld [vmem:[#allocation7 + $0xa8] ss:$12 sps:$4 sm:$0xff]  }
  0x5c   :  { %1365 = vmatpush3.bf16.msra.mxu1 %v1500_v39  ;;  %854 = vmatprep.mubr.bf16.mxu1 %v1534_v8  ;;  %v1574_v39 = vld [vmem:[#allocation7 + $0xac] ss:$12 sps:$4 sm:$0xff]  }
  0x5d   :  { %1366 = vmatprep.subr.bf16.mxu1 %v1503_v42  ;;  %v1681_v42 = vmov 0  }
  0x5e   :  { %1345 = vmatpush3.bf16.msra.mxu0 %v1502_v41  ;;  %v1575_v41 = vld [vmem:[#allocation7 + $0xb0] ss:$12 sps:$4 sm:$0xff]  }
  0x5f   :  { %1346 = vmatprep.subr.bf16.mxu0 %v1505_v44  ;;  %v1192_v44 = vld [vmem:[%s1787_s3] ss:$0 sm:$0xff] }
  0x60   :  { %1367 = vmatpush3.bf16.msra.mxu1 %v1504_v43 }
  0x61   :  { %1368 = vmatprep.subr.bf16.mxu1 %v1507_v46 }
  0x62   :  { %1347 = vmatpush3.bf16.msra.mxu0 %v1506_v45 }
  0x63   :  { %1348 = vmatprep.subr.bf16.mxu0 %v1509_v48 }
  0x64   :  { %1369 = vmatpush3.bf16.msra.mxu1 %v1508_v47 }
  0x65   :  { %1370 = vmatprep.subr.bf16.mxu1 %v1511_v50 }
  0x66   :  { %1349 = vmatpush3.bf16.msra.mxu0 %v1510_v49 }
  0x67   :  { %1350 = vmatprep.subr.bf16.mxu0 %v1513_v52 }
  0x68   :  { %1371 = vmatpush3.bf16.msra.mxu1 %v1512_v51 }
  0x69   :  { %1372 = vmatprep.subr.bf16.mxu1 %v1515_v54 }
  0x6a   :  { %1351 = vmatpush3.bf16.msra.mxu0 %v1514_v53 }
  0x6b   :  { %1352 = vmatprep.subr.bf16.mxu0 %v1517_v56 }
  0x6c   :  { %1373 = vmatpush3.bf16.msra.mxu1 %v1516_v55 }
  0x6d   :  { %1374 = vmatprep.subr.bf16.mxu1 %v1519_v58 }
  0x6e   :  { %1353 = vmatpush3.bf16.msra.mxu0 %v1518_v57 }
  0x6f   :  { %1354 = vmatprep.subr.bf16.mxu0 %v1521_v60 }
  0x70   :  { %1375 = vmatpush3.bf16.msra.mxu1 %v1520_v59 }
  0x71   :  { %1376 = vmatprep.subr.bf16.mxu1 %v1523_v62 }
  0x72   :  { %1355 = vmatpush3.bf16.msra.mxu0 %v1522_v61 }
  0x73   :  { %1356 = vmatprep.subr.bf16.mxu0 %v1525_v0 }
  0x74   :  { %1377 = vmatpush3.bf16.msra.mxu1 %v1524_v63 }
  0x75   :  { %1378 = vmatprep.subr.bf16.mxu1 %v1527_v2 }
  0x76   :  { %1357 = vmatpush3.bf16.msra.mxu0 %v1526_v1 }
  0x77   :  { %1404 = vmatprep.subr.bf16.mxu0 %v1679_v6 }
  0x78   :  { %1379 = vmatpush3.bf16.msra.mxu1 %v1531_v5 }
  0x79   :  { %814 = vmatmul.mubr.bf16.vlgmr.msra.gmra.mrb[4].mxu0 %v1528_v3  ;;  %1084 = vmatprep.subr.bf16.mxu1 %v1546_v19 }
  0x7a   :  { %1420 = vmatprep.mubr.msk.bf16.mxu0 %vm1680_vm0, %v1679_v6  ;;  %1405 = vmatpush3.bf16.msra.mxu0 %v1535_v9 }
  0x7b   :  { %855 = vmatmul.mubr.bf16.vlgmr.msra.gmra.mrb[4].mxu1 %v1532_v7  ;;  %1406 = vmatprep.subr.bf16.mxu0 %v1679_v6 }
  0x7c   :  { %1085 = vmatpush1.bf16.msra.mxu1 %v1544_v18  ;;  %1116 = vmatprep.mubr.bf16.mxu1 %v1681_v42 }
  0x7d   :  { %1086 = vmatprep.subr.bf16.mxu1 %v1550_v21  ;;  %v941_v21 = vlaneseq }
  0x7e   :  { %1407 = vmatpush3.bf16.msra.mxu0 %v1536_v10 }
  0x7f   :  { %1408 = vmatprep.subr.bf16.mxu0 %v1679_v6 }
  0x80   :  { %1087 = vmatpush1.bf16.msra.mxu1 %v1548_v23 }
  0x81   :  { %1088 = vmatprep.subr.bf16.mxu1 %v1554_v24 }
  0x82   :  { %1409 = vmatpush3.bf16.msra.mxu0 %v1537_v11 }
  0x83   :  { %1410 = vmatprep.subr.bf16.mxu0 %v1679_v6 }
  0x84   :  { %1089 = vmatpush1.bf16.msra.mxu1 %v1552_v26 }
  0x85   :  { %1090 = vmatprep.subr.bf16.mxu1 %v1558_v27 }
  0x86   :  { %1411 = vmatpush3.bf16.msra.mxu0 %v1538_v12 }
  0x87   :  { %1412 = vmatprep.subr.bf16.mxu0 %v1679_v6 }
  0x88   :  { %1091 = vmatpush1.bf16.msra.mxu1 %v1556_v29 }
  0x89   :  { %1092 = vmatprep.subr.bf16.mxu1 %v1562_v30 }
  0x8a   :  { %1413 = vmatpush3.bf16.msra.mxu0 %v1539_v13 }
  0x8b   :  { %1414 = vmatprep.subr.bf16.mxu0 %v1679_v6 }
  0x8c   :  { %1093 = vmatpush1.bf16.msra.mxu1 %v1560_v32 }
  0x8d   :  { %1094 = vmatprep.subr.bf16.mxu1 %v1566_v33 }
  0x8e   :  { %1415 = vmatpush3.bf16.msra.mxu0 %v1540_v14 }
  0x8f   :  { %1416 = vmatprep.subr.bf16.mxu0 %v1679_v6 }
  0x90   :  { %1095 = vmatpush1.bf16.msra.mxu1 %v1564_v35 }
  0x91   :  { %1096 = vmatprep.subr.bf16.mxu1 %v1570_v36 }
  0x92   :  { %1417 = vmatpush3.bf16.msra.mxu0 %v1541_v15 }
  0x93   :  { %1418 = vmatprep.subr.bf16.mxu0 %v1679_v6 }
  0x94   :  { %1097 = vmatpush1.bf16.msra.mxu1 %v1568_v37 }
  0x95   :  { %1098 = vmatprep.subr.bf16.mxu1 %v1574_v39 }
  0x96   :  { %1419 = vmatpush3.bf16.msra.mxu0 %v1542_v16 }
  0x97   :  { %1424 = vmatprep.subr.bf16.mxu0 %v1679_v6 }
  0x98   :  { %1099 = vmatpush1.bf16.msra.mxu1 %v1572_v40 }
  0x99   :  { %1421 = vmatmul.mubr.bf16.vlgmr.msra.gmra.mrb[8].mxu0 %v1543_v17 }
  0x9a   :  { %1440 = vmatprep.mubr.msk.bf16.mxu0 %vm1680_vm0, %v1679_v6  ;;  %1425 = vmatpush3.bf16.msra.mxu0 %v1547_v20 }
  0x9b   :  { %1426 = vmatprep.subr.bf16.mxu0 %v1679_v6 }
  0x9e   :  { %1427 = vmatpush3.bf16.msra.mxu0 %v1551_v22  ;;  %v942_v22 = vshrl.u32 %v941_v21, 7 }
  0x9f   :  { %1428 = vmatprep.subr.bf16.mxu0 %v1679_v6 }
  0xa0   :  { %v943_v23 = vsub.s32 0, %v942_v22  ;;  %v951_v24 = vsub.s32 2, %v942_v22  ;;  %v947_v26 = vsub.s32 1, %v942_v22 }
  0xa2   :  { %1429 = vmatpush3.bf16.msra.mxu0 %v1555_v25  ;;  %v939_v25 = vld [vmem:[%s1787_s3 + $0x1] sm:$0x7]  ;;  %s1642_s3 = scalar_lea.vmem %s1180_s7, 768 }
  0xa3   :  { %1430 = vmatprep.subr.bf16.mxu0 %v1679_v6  ;;  %v944_v27 = vrot.slane %v939_v25, %v943_v23  ;;  %v948_v29 = vrot.slane %v939_v25, %v947_v26  ;;  %p1643_p10 = scmp.ne.s32.totalorder %s1180_s7, %s1642_s3  ;;  %p1648_p12 = scmp.lt.s32.totalorder %s1642_s3, %s1642_s3 }
  0xa5   :  { %p1649_p13 = por %p1648_p12, %p1647_p11 }
  0xa6   :  { %1431 = vmatpush3.bf16.msra.mxu0 %v1559_v28  ;;  %v952_v28 = vrot.slane %v939_v25, %v951_v24 }
  0xa7   :  { %1432 = vmatprep.subr.bf16.mxu0 %v1679_v6  ;;  %p1650_p0 = pnand %p1649_p13, %p1643_p10 }
  0xaa   :  { %1433 = vmatpush3.bf16.msra.mxu0 %v1563_v31 }
  0xab   :  { %1434 = vmatprep.subr.bf16.mxu0 %v1679_v6 }
  0xae   :  { %1435 = vmatpush3.bf16.msra.mxu0 %v1567_v34 }
  0xaf   :  { %1436 = vmatprep.subr.bf16.mxu0 %v1679_v6 }
  0xb2   :  { %1437 = vmatpush3.bf16.msra.mxu0 %v1571_v38 }
  0xb3   :  { %1438 = vmatprep.subr.bf16.mxu0 %v1679_v6 }
  0xb6   :  { %1439 = vmatpush3.bf16.msra.mxu0 %v1575_v41 }
 0x12c   :  { %v1314_v43 = vpop.f32.mrb[0].mxu0 }
 0x12d   :  { %v1315_v45 = vpop.f32.mrb[1].mxu0 }
 0x12e   :  { %v1316_v46 = vadd.f32 %v1315_v45, %v1314_v43  ;;  %v1317_v47 = vpop.f32.mrb[2].mxu0  ;;  %v1336_v48 = vpop.f32.mrb[0].mxu1 }
 0x12f   :  { %v1318_v49 = vpop.f32.mrb[3].mxu0  ;;  %v1337_v52 = vpop.f32.mrb[1].mxu1 }
 0x130   :  { %v734_v50 = vadd.f32 %v1316_v46, %v1192_v44  ;;  %v1319_v51 = vadd.f32 %v1318_v49, %v1317_v47  ;;  %v1338_v53 = vadd.f32 %v1337_v52, %v1336_v48  ;;  %v1339_v54 = vpop.f32.mrb[2].mxu1 }
 0x131   :  { %v1340_v56 = vpop.f32.mrb[3].mxu1 }
 0x132   :  { %v737_v55 = vadd.f32 %v1319_v51, %v1192_v44  ;;  %v775_v57 = vadd.f32 %v1338_v53, %v734_v50  ;;  %v1341_v58 = vadd.f32 %v1340_v56, %v1339_v54 }
 0x134   :  { %v778_v59 = vadd.f32 %v1341_v58, %v737_v55 }
 0x14c   :  { %v1358_v60 = vpop.f32.mrb[4].mxu0 }
 0x14d   :  { %v1359_v61 = vpop.f32.mrb[5].mxu0 }
 0x14e   :  { %v1360_v62 = vadd.f32 %v1359_v61, %v1358_v60  ;;  %v1361_v63 = vpop.f32.mrb[6].mxu0  ;;  %v1380_v0 = vpop.f32.mrb[4].mxu1 }
 0x14f   :  { %v1362_v1 = vpop.f32.mrb[7].mxu0  ;;  %v1381_v4 = vpop.f32.mrb[5].mxu1 }
 0x150   :  { %v816_v2 = vadd.f32 %v1360_v62, %v775_v57  ;;  %v1363_v3 = vadd.f32 %v1362_v1, %v1361_v63  ;;  %v1382_v5 = vadd.f32 %v1381_v4, %v1380_v0  ;;  %v1383_v6 = vpop.f32.mrb[6].mxu1 }
 0x151   :  { %v1384_v8 = vpop.f32.mrb[7].mxu1 }
 0x152   :  { %v819_v7 = vadd.f32 %v1363_v3, %v778_v59  ;;  %v1385_v9 = vadd.f32 %v1384_v8, %v1383_v6  ;;  %v857_v10 = vadd.f32 %v1382_v5, %v816_v2 }
 0x154   :  { %v860_v11 = vadd.f32 %v1385_v9, %v819_v7 }
 0x16c   :  { %v897_v12 = vpop.f32.mrb[8].mxu0 }
 0x16d   :  { %v898_v13 = vadd.f32 %v897_v12, %v857_v10  ;;  %v1422_v14 = vpop.f32.mrb[9].mxu0 }
 0x16e   :  { %v900_v15 = vpop.f32.mrb[10].mxu0 }
 0x16f   :  { %v901_v16 = vadd.f32 %v900_v15, %v860_v11  ;;  %v1423_v17 = vpop.f32.mrb[11].mxu0  ;;  %v904_v18 = vmax.f32 %v898_v13, 0.0 }
 0x171   :  { %v905_v19 = vmax.f32 %v901_v16, 0.0 }
 0x173   :  { %v906_v20 = vpack.c.bf16 %v905_v19, %v904_v18 }
 0x175   :  { %1117 = vmatmul.mubr.bf16.vlgmr.msra.gmra.mrb[8].mxu1 %v906_v20  ;;  %1441 = vmatmul.mubr.bf16.vlgmr.msra.gmra.mrb[12].mxu0 %v906_v20 }
 0x248   :  { %v1118_v30 = vpop.f32.mrb[8].mxu1  ;;  %v1161_v31 = vpop.f32.mrb[12].mxu0 }
 0x249   :  { %v1119_v32 = vadd.f32 %v1118_v30, %v944_v27  ;;  %v1162_v33 = vadd.f32 %v1161_v31, %v952_v28  ;;  %v1120_v34 = vpop.f32.mrb[9].mxu1  ;;  %v1442_v35 = vpop.f32.mrb[13].mxu0 }
 0x24a   :  { %v1121_v36 = vadd.f32 %v1120_v34, %v948_v29  ;;  %v1122_v37 = vpop.f32.mrb[10].mxu1  ;;  %v1164_v38 = vpop.f32.mrb[14].mxu0 }
 0x24b   :  { %1168 = vst [vmem:[#allocation8] sm:$0xff] %v1119_v32  ;;  %1170 = vst [vmem:[#allocation8 + $0x10] sm:$0xff] %v1162_v33  ;;  %v1123_v39 = vadd.f32 %v1122_v37, %v944_v27  ;;  %v1165_v40 = vadd.f32 %v1164_v38, %v952_v28  ;;  %v1124_v41 = vpop.f32.mrb[11].mxu1  ;;  %v1443_v42 = vpop.f32.mrb[15].mxu0 }
 0x24c   :  { %1169 = vst [vmem:[#allocation8 + $0x8] sm:$0xff] %v1121_v36  ;;  %v1125_v43 = vadd.f32 %v1124_v41, %v948_v29 }
 0x24d   :  { %1171 = vst [vmem:[#allocation8 + $0x18] sm:$0xff] %v1123_v39  ;;  %1173 = vst [vmem:[#allocation8 + $0x28] sm:$0xff] %v1165_v40 }
 0x24e   :  { %1172 = vst [vmem:[#allocation8 + $0x20] sm:$0xff] %v1125_v43 }
 0x24f   :  { %1653 = shalt.err (!%p1650_p0)
}
 0x250   :  { %s1654_s10 = scalar_lea.hbm %s1788_s4, 768 }
 0x251   :  { %p1655_p1 = scmp.ne.s32.totalorder %s1788_s4, %s1654_s10  ;;  %p1658_p2 = scmp.lt.u32.totalorder %s1654_s10, %s1788_s4 }
 0x253   :  { %p1660_p3 = pnand %p1658_p2, %p1655_p1 }
 0x255   :  { %1663 = shalt.err (!%p1660_p3)
}
 0x256   :  { %s1683_s14 = smov 384   ;;  %s1684_s15 = smov 24  }
 0x257   :  { %1185 = dma.vmem_to_hbm [thread:$0]  %s1180_s7, 768, %s1788_s4, [#allocation4], %s1683_s14, %s1683_s14, %s1684_s15  }
 0x258   :  { %1668 = dma.done.wait [#allocation4], 768  }
 0x259   :  { %1669 = vsyncadd [#allocation4], 4294966528 }
 0x25a   :  { %1189 = vsyncpa [#allocation3], 1 }
 0x25b   :  { %1190 = vsyncpa [#allocation6], 1 }
 0x25c   :  { %1191 = vsyncpa [#allocation4], 1 }

</bundles_post_ra>
